<compile_context>
chip_gen: v7x
topology: tpu7x:2x2x1
jax: 0.10.0
libtpu: 0.0.40
codegen_flags: <defaults>
</compile_context>

<pallas_src>
import numpy as np
import jax
import jax.numpy as jnp
from jax.experimental import pallas as pl
from jax.experimental.pallas import tpu as pltpu


# ---------------------------------------------------------------------------
# JPEG constants (deterministic "parameters" of this synthetic module)
# ---------------------------------------------------------------------------

_Q_LUMA = np.array(
    [[16, 11, 10, 16, 24, 40, 51, 61],
     [12, 12, 14, 19, 26, 58, 60, 55],
     [14, 13, 16, 24, 40, 57, 69, 56],
     [14, 17, 22, 29, 51, 87, 80, 62],
     [18, 22, 37, 56, 68, 109, 103, 77],
     [24, 35, 55, 64, 81, 104, 113, 92],
     [49, 64, 78, 87, 103, 121, 120, 101],
     [72, 92, 95, 98, 112, 100, 103, 99]], dtype=np.float32)

_Q_CHROMA = np.array(
    [[17, 18, 24, 47, 99, 99, 99, 99],
     [18, 21, 26, 66, 99, 99, 99, 99],
     [24, 26, 56, 99, 99, 99, 99, 99],
     [47, 66, 99, 99, 99, 99, 99, 99],
     [99, 99, 99, 99, 99, 99, 99, 99],
     [99, 99, 99, 99, 99, 99, 99, 99],
     [99, 99, 99, 99, 99, 99, 99, 99],
     [99, 99, 99, 99, 99, 99, 99, 99]], dtype=np.float32)


def _scale_quant_table(q_tab: np.ndarray, quality: int) -> np.ndarray:
    """libjpeg quality scaling of a base quantization table."""
    quality = int(np.clip(quality, 1, 100))
    scale = 5000.0 / quality if quality < 50 else 200.0 - 2.0 * quality
    q = np.floor((q_tab * scale + 50.0) / 100.0)
    return np.clip(q, 1.0, 255.0).astype(np.float32)


def _dct8_matrix() -> np.ndarray:
    """Orthonormal 8x8 DCT-II basis."""
    n = np.arange(8)
    k = n[:, None]
    d = np.cos(np.pi * (2.0 * n[None, :] + 1.0) * k / 16.0)
    d *= np.sqrt(2.0 / 8.0)
    d[0, :] = np.sqrt(1.0 / 8.0)
    return d.astype(np.float32)


def _pick_tile(dim: int, candidates) -> int:
    """Largest candidate tile that evenly divides `dim`, else the full dim."""
    for t in candidates:
        if dim >= t and dim % t == 0:
            return t
    return dim


def _pick_block(tile: int) -> int:
    """Sub-block / operator edge for one axis (<= 128 whenever possible)."""
    if tile % 128 == 0:
        return 128
    if tile <= 256:
        return tile
    for b in (64, 32, 16, 8):
        if tile % b == 0:
            return b
    return tile  # unreachable (tile is a multiple of 8)


# ---------------------------------------------------------------------------
# Pallas kernel: fused color-convert -> blockwise DCT -> quant -> IDCT -> RGB
# ---------------------------------------------------------------------------

def _make_jpeg_kernel(TH, TW, SH, SW):
    n_h, n_w = TH // SH, TW // SW
    fuse = (SW == 128)  # lane-aligned plane fusion for the row transforms

    def kernel(x_ref, oph_ref, opht_ref, opw_ref, opwt_ref, qi_ref, q_ref, o_ref):
        # x_ref   : (1, 3, TH, TW) uint8 RGB tile
        # oph/opht: (SH, SH) bf16 block-diag DCT operator (rows) / transpose
        # opw/opwt: (SW, SW) bf16 block-diag DCT operator (cols) / transpose
        # qi_ref  : (2, SH, SW) f32 reciprocal quant tables (luma, chroma)
        # q_ref   : (2, SH, SW) f32 quant tables (luma, chroma)
        # o_ref   : (1, 3, TH, TW) uint8 reconstructed RGB tile
        oph, opht = oph_ref[...], opht_ref[...]
        opw, opwt = opw_ref[...], opwt_ref[...]
        qi_y, qi_c = qi_ref[0], qi_ref[1]
        q_y, q_c = q_ref[0], q_ref[1]

        def row_transform(op, planes):
            # op @ p for each plane; planes fused along the lane axis (N=3*SW)
            # when lane-aligned -> fewer MXU launches, better N fill.
            if fuse:
                st = jnp.concatenate([p.astype(jnp.bfloat16) for p in planes],
                                     axis=1)
                out = jnp.dot(op, st, preferred_element_type=jnp.float32)
                return [out[:, i * SW:(i + 1) * SW] for i in range(len(planes))]
            return [jnp.dot(op, p.astype(jnp.bfloat16),
                            preferred_element_type=jnp.float32) for p in planes]

        def col_quant(c, qi, q):
            # Forward column DCT + lossy quantize / dequantize (no divides).
            c = jnp.dot(c.astype(jnp.bfloat16), opwt,
                        preferred_element_type=jnp.float32)
            return jnp.round(c * qi) * q

        def col_inv(c):
            return jnp.dot(c.astype(jnp.bfloat16), opw,
                           preferred_element_type=jnp.float32)

        def to_u8(v):
            v = jnp.clip(jnp.round(v), 0.0, 255.0)
            return v.astype(jnp.int32).astype(jnp.uint8)

        for hb in range(n_h):
            hs = hb * SH
            for wb in range(n_w):
                ws = wb * SW
                # Load one (SH, SW) sub-block per channel; widen u8 -> f32.
                r = x_ref[0, 0, hs:hs + SH, ws:ws + SW]
                g = x_ref[0, 1, hs:hs + SH, ws:ws + SW]
                b = x_ref[0, 2, hs:hs + SH, ws:ws + SW]
                r = r.astype(jnp.int32).astype(jnp.float32)
                g = g.astype(jnp.int32).astype(jnp.float32)
                b = b.astype(jnp.int32).astype(jnp.float32)

                # Fused RGB -> YCbCr with the JPEG -128 level shift (VPU).
                y = 0.299 * r + 0.587 * g + 0.114 * b - 128.0
                cb = -0.168736 * r - 0.331264 * g + 0.5 * b
                cr = 0.5 * r - 0.418688 * g - 0.081312 * b

                # Forward row DCT (planes fused along lanes).
                cy, ccb, ccr = row_transform(oph, [y, cb, cr])
                # Forward column DCT + quant / dequant (per plane).
                cy = col_quant(cy, qi_y, q_y)
                ccb = col_quant(ccb, qi_c, q_c)
                ccr = col_quant(ccr, qi_c, q_c)
                # Inverse row DCT (fused), then inverse column DCT (per plane).
                py, pcb, pcr = row_transform(opht, [cy, ccb, ccr])
                y_r, cb_r, cr_r = col_inv(py), col_inv(pcb), col_inv(pcr)

                # Un-shift + YCbCr -> RGB + decoder clip/round, store as uint8.
                yp = y_r + 128.0
                o_ref[0, 0, hs:hs + SH, ws:ws + SW] = to_u8(yp + 1.402 * cr_r)
                o_ref[0, 1, hs:hs + SH, ws:ws + SW] = to_u8(
                    yp - 0.344136 * cb_r - 0.714136 * cr_r)
                o_ref[0, 2, hs:hs + SH, ws:ws + SW] = to_u8(yp + 1.772 * cb_r)

    return kernel


def _jpeg_roundtrip(x_u8, oph, opht, opw, opwt, q_inv, q, TH, TW, SH, SW):
    """Run the fused JPEG round-trip kernel over an NCHW uint8 RGB tensor."""
    N, C, H, W = x_u8.shape
    grid = (N, H // TH, W // TW)
    kernel = _make_jpeg_kernel(TH, TW, SH, SW)
    return pl.pallas_call(
        kernel,
        out_shape=jax.ShapeDtypeStruct((N, C, H, W), jnp.uint8),
        grid_spec=pltpu.PrefetchScalarGridSpec(
            num_scalar_prefetch=0,
            grid=grid,
            in_specs=[
                pl.BlockSpec((1, 3, TH, TW), lambda n, i, j: (n, 0, i, j)),
                # Grid-invariant operands: constant index_map -> DMA'd once.
                pl.BlockSpec((SH, SH), lambda n, i, j: (0, 0)),
                pl.BlockSpec((SH, SH), lambda n, i, j: (0, 0)),
                pl.BlockSpec((SW, SW), lambda n, i, j: (0, 0)),
                pl.BlockSpec((SW, SW), lambda n, i, j: (0, 0)),
                pl.BlockSpec((2, SH, SW), lambda n, i, j: (0, 0, 0)),
                pl.BlockSpec((2, SH, SW), lambda n, i, j: (0, 0, 0)),
            ],
            out_specs=pl.BlockSpec((1, 3, TH, TW), lambda n, i, j: (n, 0, i, j)),
        ),
        compiler_params=pltpu.CompilerParams(
            dimension_semantics=("parallel", "parallel", "parallel"),
            vmem_limit_bytes=32 * 1024 * 1024,
        ),
    )(x_u8, oph, opht, opw, opwt, q_inv, q)


# ---------------------------------------------------------------------------
# Module wrapper
# ---------------------------------------------------------------------------

class JPEGinMemoryPallas:
    """JPEG in-memory round-trip approximation.

    Input: NCHW RGB images (uint8, or float in [0, 255] which is rounded).
    Output: NCHW uint8 RGB images (decoded-JPEG pixel domain).
    """

    _H_TILES = (256, 128, 64, 32)
    _W_TILES = (512, 256, 128)

    def __init__(self, quality_range=(30, 100)):
        self.quality_range = quality_range
        # Deterministic quality: midpoint of the range (random.randint in the
        # original module).
        self.quality = int((quality_range[0] + quality_range[1]) // 2)
        self.q_luma = _scale_quant_table(_Q_LUMA, self.quality)
        self.q_chroma = _scale_quant_table(_Q_CHROMA, self.quality)
        self.d8 = _dct8_matrix()

    def _operands(self, SH, SW):
        oph = np.kron(np.eye(SH // 8, dtype=np.float32), self.d8)
        opw = np.kron(np.eye(SW // 8, dtype=np.float32), self.d8)
        oph_j = jnp.asarray(oph, dtype=jnp.bfloat16)
        opht_j = jnp.asarray(oph.T.copy(), dtype=jnp.bfloat16)
        opw_j = jnp.asarray(opw, dtype=jnp.bfloat16)
        opwt_j = jnp.asarray(opw.T.copy(), dtype=jnp.bfloat16)

        q_y = np.tile(self.q_luma, (SH // 8, SW // 8))
        q_c = np.tile(self.q_chroma, (SH // 8, SW // 8))
        q = np.stack([q_y, q_c], axis=0).astype(np.float32)          # (2,SH,SW)
        q_inv = (np.float32(1.0) / q).astype(np.float32)
        return oph_j, opht_j, opw_j, opwt_j, jnp.asarray(q_inv), jnp.asarray(q)

    def __call__(self, img_nchw: jnp.ndarray) -> jnp.ndarray:
        x = img_nchw
        if x.dtype != jnp.uint8:
            x = jnp.clip(jnp.round(x.astype(jnp.float32)), 0.0, 255.0)
            x = x.astype(jnp.uint8)
        N, C, H, W = x.shape
        assert C == 3, "JPEG round-trip expects RGB (3 channels)"
        assert H % 8 == 0 and W % 8 == 0, "H and W must be multiples of 8"

        TH = _pick_tile(H, self._H_TILES)
        TW = _pick_tile(W, self._W_TILES)
        SH = _pick_block(TH)
        SW = _pick_block(TW)

        oph, opht, opw, opwt, q_inv, q = self._operands(SH, SW)
        return _jpeg_roundtrip(x, oph, opht, opw, opwt, q_inv, q, TH, TW, SH, SW)


# ---------------------------------------------------------------------------
# Pure-JAX reference (same math / same casts) for a correctness sanity check
# ---------------------------------------------------------------------------

def _reference_roundtrip(x_u8, d8, q_luma, q_chroma):
    x = x_u8.astype(jnp.float32)
    N, C, H, W = x.shape
    r, g, b = x[:, 0], x[:, 1], x[:, 2]
    y = 0.299 * r + 0.587 * g + 0.114 * b - 128.0
    cb = -0.168736 * r - 0.331264 * g + 0.5 * b
    cr = 0.5 * r - 0.418688 * g - 0.081312 * b

    oph = jnp.asarray(np.kron(np.eye(H // 8, dtype=np.float32), d8), jnp.bfloat16)
    opw = jnp.asarray(np.kron(np.eye(W // 8, dtype=np.float32), d8), jnp.bfloat16)
    qy = np.tile(q_luma, (H // 8, W // 8)).astype(np.float32)
    qc = np.tile(q_chroma, (H // 8, W // 8)).astype(np.float32)

    def rt(p, q_np):
        q = jnp.asarray(q_np)
        qi = jnp.asarray((np.float32(1.0) / q_np).astype(np.float32))
        c = jnp.einsum('hk,nkw->nhw', oph, p.astype(jnp.bfloat16),
                       preferred_element_type=jnp.float32)
        c = jnp.einsum('nhw,vw->nhv', c.astype(jnp.bfloat16), opw,
                       preferred_element_type=jnp.float32)
        c = jnp.round(c * qi) * q
        p2 = jnp.einsum('kh,nkw->nhw', oph, c.astype(jnp.bfloat16),
                        preferred_element_type=jnp.float32)
        p2 = jnp.einsum('nhw,wv->nhv', p2.astype(jnp.bfloat16), opw,
                        preferred_element_type=jnp.float32)
        return p2

    y_r, cb_r, cr_r = rt(y, qy), rt(cb, qc), rt(cr, qc)
    yp = y_r + 128.0
    r_o = yp + 1.402 * cr_r
    g_o = yp - 0.344136 * cb_r - 0.714136 * cr_r
    b_o = yp + 1.772 * cb_r
    out = jnp.stack([r_o, g_o, b_o], axis=1)
    return jnp.clip(jnp.round(out), 0.0, 255.0).astype(jnp.uint8)


if __name__ == "__main__":
    key = jax.random.PRNGKey(0)
    # Small NCHW RGB uint8 image batch (decoded-JPEG pixel domain).
    x = jax.random.randint(key, (2, 3, 16, 128), 0, 256,
                           dtype=jnp.int32).astype(jnp.uint8)

    module = JPEGinMemoryPallas(quality_range=(30, 100))
    out = jax.block_until_ready(module(x))

    assert out.shape == x.shape and out.dtype == jnp.uint8

    ref = jax.block_until_ready(
        _reference_roundtrip(x, module.d8, module.q_luma, module.q_chroma))
    diff = jnp.abs(out.astype(jnp.int32) - ref.astype(jnp.int32))
    assert float(jnp.mean(diff)) < 3.0, float(jnp.mean(diff))
    assert int(jnp.max(diff)) < 64, int(jnp.max(diff))
    print("KERNEL_OK")
</pallas_src>

<mosaic_0001>
module attributes {stable_mosaic.version = 11 : i64} {
  func.func @kernel(%arg0: i32, %arg1: i32, %arg2: i32, %arg3: memref<1x3x16x128xi8, #tpu.memory_space<vmem>>, %arg4: memref<16x16xbf16, #tpu.memory_space<vmem>>, %arg5: memref<16x16xbf16, #tpu.memory_space<vmem>>, %arg6: memref<128x128xbf16, #tpu.memory_space<vmem>>, %arg7: memref<128x128xbf16, #tpu.memory_space<vmem>>, %arg8: memref<2x16x128xf32, #tpu.memory_space<vmem>>, %arg9: memref<2x16x128xf32, #tpu.memory_space<vmem>>, %arg10: memref<1x3x16x128xi8, #tpu.memory_space<vmem>>) attributes {dimension_semantics = [#tpu.dimension_semantics<parallel>, #tpu.dimension_semantics<parallel>, #tpu.dimension_semantics<parallel>], iteration_bounds = array<i64: 2, 1, 1>, scalar_prefetch = 0 : i64, scratch_operands = 0 : i64, tpu.core_type = #tpu.core_type<tc>, window_params = [{transform_indices = @transform_0, window_bounds = array<i64: 1, 3, 16, 128>}, {pipeline_mode = #tpu.pipeline_mode<synchronous>, transform_indices = @transform_1, window_bounds = array<i64: 16, 16>}, {pipeline_mode = #tpu.pipeline_mode<synchronous>, transform_indices = @transform_2, window_bounds = array<i64: 16, 16>}, {pipeline_mode = #tpu.pipeline_mode<synchronous>, transform_indices = @transform_3, window_bounds = array<i64: 128, 128>}, {pipeline_mode = #tpu.pipeline_mode<synchronous>, transform_indices = @transform_4, window_bounds = array<i64: 128, 128>}, {pipeline_mode = #tpu.pipeline_mode<synchronous>, transform_indices = @transform_5, window_bounds = array<i64: 2, 16, 128>}, {pipeline_mode = #tpu.pipeline_mode<synchronous>, transform_indices = @transform_6, window_bounds = array<i64: 2, 16, 128>}, {transform_indices = @transform_7, window_bounds = array<i64: 1, 3, 16, 128>}]} {
    %c0 = arith.constant 0 : index
    %c0_0 = arith.constant 0 : index
    %0 = vector.load %arg4[%c0, %c0_0] : memref<16x16xbf16, #tpu.memory_space<vmem>>, vector<16x16xbf16>
    %c0_1 = arith.constant 0 : index
    %c0_2 = arith.constant 0 : index
    %1 = vector.load %arg5[%c0_1, %c0_2] : memref<16x16xbf16, #tpu.memory_space<vmem>>, vector<16x16xbf16>
    %c0_3 = arith.constant 0 : index
    %c0_4 = arith.constant 0 : index
    %2 = vector.load %arg6[%c0_3, %c0_4] : memref<128x128xbf16, #tpu.memory_space<vmem>>, vector<128x128xbf16>
    %c0_5 = arith.constant 0 : index
    %c0_6 = arith.constant 0 : index
    %3 = vector.load %arg7[%c0_5, %c0_6] : memref<128x128xbf16, #tpu.memory_space<vmem>>, vector<128x128xbf16>
    %c0_7 = arith.constant 0 : index
    %c0_8 = arith.constant 0 : index
    %c0_9 = arith.constant 0 : index
    %4 = vector.load %arg8[%c0_7, %c0_8, %c0_9] : memref<2x16x128xf32, #tpu.memory_space<vmem>>, vector<1x16x128xf32>
    %5 = vector.shape_cast %4 : vector<1x16x128xf32> to vector<16x128xf32>
    %c1 = arith.constant 1 : index
    %c0_10 = arith.constant 0 : index
    %c0_11 = arith.constant 0 : index
    %6 = vector.load %arg8[%c1, %c0_10, %c0_11] : memref<2x16x128xf32, #tpu.memory_space<vmem>>, vector<1x16x128xf32>
    %7 = vector.shape_cast %6 : vector<1x16x128xf32> to vector<16x128xf32>
    %c0_12 = arith.constant 0 : index
    %c0_13 = arith.constant 0 : index
    %c0_14 = arith.constant 0 : index
    %8 = vector.load %arg9[%c0_12, %c0_13, %c0_14] : memref<2x16x128xf32, #tpu.memory_space<vmem>>, vector<1x16x128xf32>
    %9 = vector.shape_cast %8 : vector<1x16x128xf32> to vector<16x128xf32>
    %c1_15 = arith.constant 1 : index
    %c0_16 = arith.constant 0 : index
    %c0_17 = arith.constant 0 : index
    %10 = vector.load %arg9[%c1_15, %c0_16, %c0_17] : memref<2x16x128xf32, #tpu.memory_space<vmem>>, vector<1x16x128xf32>
    %11 = vector.shape_cast %10 : vector<1x16x128xf32> to vector<16x128xf32>
    %c0_18 = arith.constant 0 : index
    %c0_19 = arith.constant 0 : index
    %c0_20 = arith.constant 0 : index
    %c0_21 = arith.constant 0 : index
    %12 = vector.load %arg3[%c0_18, %c0_19, %c0_20, %c0_21] : memref<1x3x16x128xi8, #tpu.memory_space<vmem>>, vector<1x1x16x128xi8>
    %13 = vector.shape_cast %12 : vector<1x1x16x128xi8> to vector<16x128xi8>
    %c0_22 = arith.constant 0 : index
    %c1_23 = arith.constant 1 : index
    %c0_24 = arith.constant 0 : index
    %c0_25 = arith.constant 0 : index
    %14 = vector.load %arg3[%c0_22, %c1_23, %c0_24, %c0_25] : memref<1x3x16x128xi8, #tpu.memory_space<vmem>>, vector<1x1x16x128xi8>
    %15 = vector.shape_cast %14 : vector<1x1x16x128xi8> to vector<16x128xi8>
    %c0_26 = arith.constant 0 : index
    %c2 = arith.constant 2 : index
    %c0_27 = arith.constant 0 : index
    %c0_28 = arith.constant 0 : index
    %16 = vector.load %arg3[%c0_26, %c2, %c0_27, %c0_28] : memref<1x3x16x128xi8, #tpu.memory_space<vmem>>, vector<1x1x16x128xi8>
    %17 = vector.shape_cast %16 : vector<1x1x16x128xi8> to vector<16x128xi8>
    %18 = arith.extui %13 : vector<16x128xi8> to vector<16x128xi32>
    %19 = arith.sitofp %18 : vector<16x128xi32> to vector<16x128xf32>
    %20 = arith.extui %15 : vector<16x128xi8> to vector<16x128xi32>
    %21 = arith.sitofp %20 : vector<16x128xi32> to vector<16x128xf32>
    %22 = arith.extui %17 : vector<16x128xi8> to vector<16x128xi32>
    %23 = arith.sitofp %22 : vector<16x128xi32> to vector<16x128xf32>
    %cst = arith.constant 2.990000e-01 : f32
    %24 = vector.broadcast %cst : f32 to vector<16x128xf32>
    %25 = arith.mulf %24, %19 : vector<16x128xf32>
    %cst_29 = arith.constant 5.870000e-01 : f32
    %26 = vector.broadcast %cst_29 : f32 to vector<16x128xf32>
    %27 = arith.mulf %26, %21 : vector<16x128xf32>
    %28 = arith.addf %25, %27 : vector<16x128xf32>
    %cst_30 = arith.constant 1.140000e-01 : f32
    %29 = vector.broadcast %cst_30 : f32 to vector<16x128xf32>
    %30 = arith.mulf %29, %23 : vector<16x128xf32>
    %31 = arith.addf %28, %30 : vector<16x128xf32>
    %cst_31 = arith.constant 1.280000e+02 : f32
    %32 = vector.broadcast %cst_31 : f32 to vector<16x128xf32>
    %33 = arith.subf %31, %32 : vector<16x128xf32>
    %cst_32 = arith.constant -1.687360e-01 : f32
    %34 = vector.broadcast %cst_32 : f32 to vector<16x128xf32>
    %35 = arith.mulf %34, %19 : vector<16x128xf32>
    %cst_33 = arith.constant 3.312640e-01 : f32
    %36 = vector.broadcast %cst_33 : f32 to vector<16x128xf32>
    %37 = arith.mulf %36, %21 : vector<16x128xf32>
    %38 = arith.subf %35, %37 : vector<16x128xf32>
    %cst_34 = arith.constant 5.000000e-01 : f32
    %39 = vector.broadcast %cst_34 : f32 to vector<16x128xf32>
    %40 = arith.mulf %39, %23 : vector<16x128xf32>
    %41 = arith.addf %38, %40 : vector<16x128xf32>
    %cst_35 = arith.constant 5.000000e-01 : f32
    %42 = vector.broadcast %cst_35 : f32 to vector<16x128xf32>
    %43 = arith.mulf %42, %19 : vector<16x128xf32>
    %cst_36 = arith.constant 4.186880e-01 : f32
    %44 = vector.broadcast %cst_36 : f32 to vector<16x128xf32>
    %45 = arith.mulf %44, %21 : vector<16x128xf32>
    %46 = arith.subf %43, %45 : vector<16x128xf32>
    %cst_37 = arith.constant 8.131200e-02 : f32
    %47 = vector.broadcast %cst_37 : f32 to vector<16x128xf32>
    %48 = arith.mulf %47, %23 : vector<16x128xf32>
    %49 = arith.subf %46, %48 : vector<16x128xf32>
    %50 = arith.truncf %33 : vector<16x128xf32> to vector<16x128xbf16>
    %51 = arith.truncf %41 : vector<16x128xf32> to vector<16x128xbf16>
    %52 = arith.truncf %49 : vector<16x128xf32> to vector<16x128xbf16>
    %53 = tpu.concatenate %50, %51, %52 in 1 : vector<16x128xbf16>, vector<16x128xbf16>, vector<16x128xbf16> -> vector<16x384xbf16>
    %cst_38 = arith.constant dense<0.000000e+00> : vector<16x384xf32>
    %54 = tpu.matmul %0, %53, %cst_38 {dimension_numbers = #tpu.dot_dimension_numbers<[1], [0], [0], [1], [0, 0, 1, 1], [], []>} : vector<16x16xbf16>, vector<16x384xbf16>, vector<16x384xf32> -> vector<16x384xf32>
    %55 = vector.extract_strided_slice %54 {offsets = [0, 0], sizes = [16, 128], strides = [1, 1]} : vector<16x384xf32> to vector<16x128xf32>
    %56 = vector.extract_strided_slice %54 {offsets = [0, 128], sizes = [16, 128], strides = [1, 1]} : vector<16x384xf32> to vector<16x128xf32>
    %57 = vector.extract_strided_slice %54 {offsets = [0, 256], sizes = [16, 128], strides = [1, 1]} : vector<16x384xf32> to vector<16x128xf32>
    %58 = arith.truncf %55 : vector<16x128xf32> to vector<16x128xbf16>
    %cst_39 = arith.constant dense<0.000000e+00> : vector<16x128xf32>
    %59 = tpu.matmul %58, %3, %cst_39 {dimension_numbers = #tpu.dot_dimension_numbers<[1], [0], [0], [1], [0, 0, 1, 1], [], []>} : vector<16x128xbf16>, vector<128x128xbf16>, vector<16x128xf32> -> vector<16x128xf32>
    %60 = arith.mulf %59, %5 : vector<16x128xf32>
    %61 = math.roundeven %60 : vector<16x128xf32>
    %62 = arith.mulf %61, %9 : vector<16x128xf32>
    %63 = arith.truncf %56 : vector<16x128xf32> to vector<16x128xbf16>
    %cst_40 = arith.constant dense<0.000000e+00> : vector<16x128xf32>
    %64 = tpu.matmul %63, %3, %cst_40 {dimension_numbers = #tpu.dot_dimension_numbers<[1], [0], [0], [1], [0, 0, 1, 1], [], []>} : vector<16x128xbf16>, vector<128x128xbf16>, vector<16x128xf32> -> vector<16x128xf32>
    %65 = arith.mulf %64, %7 : vector<16x128xf32>
    %66 = math.roundeven %65 : vector<16x128xf32>
    %67 = arith.mulf %66, %11 : vector<16x128xf32>
    %68 = arith.truncf %57 : vector<16x128xf32> to vector<16x128xbf16>
    %cst_41 = arith.constant dense<0.000000e+00> : vector<16x128xf32>
    %69 = tpu.matmul %68, %3, %cst_41 {dimension_numbers = #tpu.dot_dimension_numbers<[1], [0], [0], [1], [0, 0, 1, 1], [], []>} : vector<16x128xbf16>, vector<128x128xbf16>, vector<16x128xf32> -> vector<16x128xf32>
    %70 = arith.mulf %69, %7 : vector<16x128xf32>
    %71 = math.roundeven %70 : vector<16x128xf32>
    %72 = arith.mulf %71, %11 : vector<16x128xf32>
    %73 = arith.truncf %62 : vector<16x128xf32> to vector<16x128xbf16>
    %74 = arith.truncf %67 : vector<16x128xf32> to vector<16x128xbf16>
    %75 = arith.truncf %72 : vector<16x128xf32> to vector<16x128xbf16>
    %76 = tpu.concatenate %73, %74, %75 in 1 : vector<16x128xbf16>, vector<16x128xbf16>, vector<16x128xbf16> -> vector<16x384xbf16>
    %cst_42 = arith.constant dense<0.000000e+00> : vector<16x384xf32>
    %77 = tpu.matmul %1, %76, %cst_42 {dimension_numbers = #tpu.dot_dimension_numbers<[1], [0], [0], [1], [0, 0, 1, 1], [], []>} : vector<16x16xbf16>, vector<16x384xbf16>, vector<16x384xf32> -> vector<16x384xf32>
    %78 = vector.extract_strided_slice %77 {offsets = [0, 0], sizes = [16, 128], strides = [1, 1]} : vector<16x384xf32> to vector<16x128xf32>
    %79 = vector.extract_strided_slice %77 {offsets = [0, 128], sizes = [16, 128], strides = [1, 1]} : vector<16x384xf32> to vector<16x128xf32>
    %80 = vector.extract_strided_slice %77 {offsets = [0, 256], sizes = [16, 128], strides = [1, 1]} : vector<16x384xf32> to vector<16x128xf32>
    %81 = arith.truncf %78 : vector<16x128xf32> to vector<16x128xbf16>
    %cst_43 = arith.constant dense<0.000000e+00> : vector<16x128xf32>
    %82 = tpu.matmul %81, %2, %cst_43 {dimension_numbers = #tpu.dot_dimension_numbers<[1], [0], [0], [1], [0, 0, 1, 1], [], []>} : vector<16x128xbf16>, vector<128x128xbf16>, vector<16x128xf32> -> vector<16x128xf32>
    %83 = arith.truncf %79 : vector<16x128xf32> to vector<16x128xbf16>
    %cst_44 = arith.constant dense<0.000000e+00> : vector<16x128xf32>
    %84 = tpu.matmul %83, %2, %cst_44 {dimension_numbers = #tpu.dot_dimension_numbers<[1], [0], [0], [1], [0, 0, 1, 1], [], []>} : vector<16x128xbf16>, vector<128x128xbf16>, vector<16x128xf32> -> vector<16x128xf32>
    %85 = arith.truncf %80 : vector<16x128xf32> to vector<16x128xbf16>
    %cst_45 = arith.constant dense<0.000000e+00> : vector<16x128xf32>
    %86 = tpu.matmul %85, %2, %cst_45 {dimension_numbers = #tpu.dot_dimension_numbers<[1], [0], [0], [1], [0, 0, 1, 1], [], []>} : vector<16x128xbf16>, vector<128x128xbf16>, vector<16x128xf32> -> vector<16x128xf32>
    %cst_46 = arith.constant 1.280000e+02 : f32
    %87 = vector.broadcast %cst_46 : f32 to vector<16x128xf32>
    %88 = arith.addf %82, %87 : vector<16x128xf32>
    %cst_47 = arith.constant 1.402000e+00 : f32
    %89 = vector.broadcast %cst_47 : f32 to vector<16x128xf32>
    %90 = arith.mulf %89, %86 : vector<16x128xf32>
    %91 = arith.addf %88, %90 : vector<16x128xf32>
    %92 = math.roundeven %91 : vector<16x128xf32>
    %cst_48 = arith.constant 0.000000e+00 : f32
    %cst_49 = arith.constant 2.550000e+02 : f32
    %93 = vector.broadcast %cst_48 : f32 to vector<16x128xf32>
    %94 = arith.maximumf %93, %92 : vector<16x128xf32>
    %95 = vector.broadcast %cst_49 : f32 to vector<16x128xf32>
    %96 = arith.minimumf %95, %94 : vector<16x128xf32>
    %97 = arith.fptosi %96 : vector<16x128xf32> to vector<16x128xi32>
    %98 = arith.trunci %97 : vector<16x128xi32> to vector<16x128xi8>
    %c0_50 = arith.constant 0 : index
    %c0_51 = arith.constant 0 : index
    %c0_52 = arith.constant 0 : index
    %c0_53 = arith.constant 0 : index
    %99 = vector.load %arg10[%c0_50, %c0_51, %c0_52, %c0_53] : memref<1x3x16x128xi8, #tpu.memory_space<vmem>>, vector<1x1x16x128xi8>
    %100 = vector.shape_cast %99 : vector<1x1x16x128xi8> to vector<16x128xi8>
    %101 = vector.shape_cast %98 : vector<16x128xi8> to vector<1x1x16x128xi8>
    tpu.vector_store %arg10[%c0_50, %c0_51, %c0_52, %c0_53], %101 {strides = array<i32>} : memref<1x3x16x128xi8, #tpu.memory_space<vmem>>, vector<1x1x16x128xi8>,
    %cst_54 = arith.constant 3.441360e-01 : f32
    %102 = vector.broadcast %cst_54 : f32 to vector<16x128xf32>
    %103 = arith.mulf %102, %84 : vector<16x128xf32>
    %104 = arith.subf %88, %103 : vector<16x128xf32>
    %cst_55 = arith.constant 7.141360e-01 : f32
    %105 = vector.broadcast %cst_55 : f32 to vector<16x128xf32>
    %106 = arith.mulf %105, %86 : vector<16x128xf32>
    %107 = arith.subf %104, %106 : vector<16x128xf32>
    %108 = math.roundeven %107 : vector<16x128xf32>
    %cst_56 = arith.constant 0.000000e+00 : f32
    %cst_57 = arith.constant 2.550000e+02 : f32
    %109 = vector.broadcast %cst_56 : f32 to vector<16x128xf32>
    %110 = arith.maximumf %109, %108 : vector<16x128xf32>
    %111 = vector.broadcast %cst_57 : f32 to vector<16x128xf32>
    %112 = arith.minimumf %111, %110 : vector<16x128xf32>
    %113 = arith.fptosi %112 : vector<16x128xf32> to vector<16x128xi32>
    %114 = arith.trunci %113 : vector<16x128xi32> to vector<16x128xi8>
    %c0_58 = arith.constant 0 : index
    %c1_59 = arith.constant 1 : index
    %c0_60 = arith.constant 0 : index
    %c0_61 = arith.constant 0 : index
    %115 = vector.load %arg10[%c0_58, %c1_59, %c0_60, %c0_61] : memref<1x3x16x128xi8, #tpu.memory_space<vmem>>, vector<1x1x16x128xi8>
    %116 = vector.shape_cast %115 : vector<1x1x16x128xi8> to vector<16x128xi8>
    %117 = vector.shape_cast %114 : vector<16x128xi8> to vector<1x1x16x128xi8>
    tpu.vector_store %arg10[%c0_58, %c1_59, %c0_60, %c0_61], %117 {strides = array<i32>} : memref<1x3x16x128xi8, #tpu.memory_space<vmem>>, vector<1x1x16x128xi8>,
    %cst_62 = arith.constant 1.772000e+00 : f32
    %118 = vector.broadcast %cst_62 : f32 to vector<16x128xf32>
    %119 = arith.mulf %118, %84 : vector<16x128xf32>
    %120 = arith.addf %88, %119 : vector<16x128xf32>
    %121 = math.roundeven %120 : vector<16x128xf32>
    %cst_63 = arith.constant 0.000000e+00 : f32
    %cst_64 = arith.constant 2.550000e+02 : f32
    %122 = vector.broadcast %cst_63 : f32 to vector<16x128xf32>
    %123 = arith.maximumf %122, %121 : vector<16x128xf32>
    %124 = vector.broadcast %cst_64 : f32 to vector<16x128xf32>
    %125 = arith.minimumf %124, %123 : vector<16x128xf32>
    %126 = arith.fptosi %125 : vector<16x128xf32> to vector<16x128xi32>
    %127 = arith.trunci %126 : vector<16x128xi32> to vector<16x128xi8>
    %c0_65 = arith.constant 0 : index
    %c2_66 = arith.constant 2 : index
    %c0_67 = arith.constant 0 : index
    %c0_68 = arith.constant 0 : index
    %128 = vector.load %arg10[%c0_65, %c2_66, %c0_67, %c0_68] : memref<1x3x16x128xi8, #tpu.memory_space<vmem>>, vector<1x1x16x128xi8>
    %129 = vector.shape_cast %128 : vector<1x1x16x128xi8> to vector<16x128xi8>
    %130 = vector.shape_cast %127 : vector<16x128xi8> to vector<1x1x16x128xi8>
    tpu.vector_store %arg10[%c0_65, %c2_66, %c0_67, %c0_68], %130 {strides = array<i32>} : memref<1x3x16x128xi8, #tpu.memory_space<vmem>>, vector<1x1x16x128xi8>,
    return
  }
  func.func @transform_0(%arg0: i32, %arg1: i32, %arg2: i32) -> (i32, i32, i32, i32) {
    %c0_i32 = arith.constant 0 : i32
    %c0_i32_0 = arith.constant 0 : i32
    return %arg0, %c0_i32, %arg1, %arg2 : i32, i32, i32, i32
  }
  func.func @transform_1(%arg0: i32, %arg1: i32, %arg2: i32) -> (i32, i32) {
    %c0_i32 = arith.constant 0 : i32
    %c0_i32_0 = arith.constant 0 : i32
    %c0_i32_1 = arith.constant 0 : i32
    return %c0_i32, %c0_i32_0 : i32, i32
  }
  func.func @transform_2(%arg0: i32, %arg1: i32, %arg2: i32) -> (i32, i32) {
    %c0_i32 = arith.constant 0 : i32
    %c0_i32_0 = arith.constant 0 : i32
    %c0_i32_1 = arith.constant 0 : i32
    return %c0_i32, %c0_i32_0 : i32, i32
  }
  func.func @transform_3(%arg0: i32, %arg1: i32, %arg2: i32) -> (i32, i32) {
    %c0_i32 = arith.constant 0 : i32
    %c0_i32_0 = arith.constant 0 : i32
    %c0_i32_1 = arith.constant 0 : i32
    return %c0_i32, %c0_i32_0 : i32, i32
  }
  func.func @transform_4(%arg0: i32, %arg1: i32, %arg2: i32) -> (i32, i32) {
    %c0_i32 = arith.constant 0 : i32
    %c0_i32_0 = arith.constant 0 : i32
    %c0_i32_1 = arith.constant 0 : i32
    return %c0_i32, %c0_i32_0 : i32, i32
  }
  func.func @transform_5(%arg0: i32, %arg1: i32, %arg2: i32) -> (i32, i32, i32) {
    %c0_i32 = arith.constant 0 : i32
    %c0_i32_0 = arith.constant 0 : i32
    %c0_i32_1 = arith.constant 0 : i32
    %c0_i32_2 = arith.constant 0 : i32
    return %c0_i32, %c0_i32_0, %c0_i32_1 : i32, i32, i32
  }
  func.func @transform_6(%arg0: i32, %arg1: i32, %arg2: i32) -> (i32, i32, i32) {
    %c0_i32 = arith.constant 0 : i32
    %c0_i32_0 = arith.constant 0 : i32
    %c0_i32_1 = arith.constant 0 : i32
    %c0_i32_2 = arith.constant 0 : i32
    return %c0_i32, %c0_i32_0, %c0_i32_1 : i32, i32, i32
  }
  func.func @transform_7(%arg0: i32, %arg1: i32, %arg2: i32) -> (i32, i32, i32, i32) {
    %c0_i32 = arith.constant 0 : i32
    %c0_i32_0 = arith.constant 0 : i32
    return %arg0, %c0_i32, %arg1, %arg2 : i32, i32, i32, i32
  }
}

</mosaic_0001>

<bundles_post_ra>
// kernel: tpu_custom_call.1
= control target key start
LH: loop header
LB: loop body
LE: loop exit
PB: predicated region body
PF: predicated region fallthrough
CT: control target
= control target key end

     0   :  { %s2546_s0 = inlined_call_operand.hbm [shape: u8[2,3,16,128], index: 0, kind: input, shape index: {}]   ;;  %s2547_s1 = inlined_call_operand.hbm [shape: bf16[16,16], index: 1, kind: input, shape index: {}]   ;;  %s2548_s2 = inlined_call_operand.hbm [shape: bf16[16,16], index: 2, kind: input, shape index: {}]   ;;  %s2549_s3 = inlined_call_operand.hbm [shape: bf16[128,128], index: 3, kind: input, shape index: {}]   ;;  %s2550_s4 = inlined_call_operand.hbm [shape: bf16[128,128], index: 4, kind: input, shape index: {}]   ;;  %s2551_s5 = inlined_call_operand.hbm [shape: f32[2,16,128], index: 5, kind: input, shape index: {}]   ;;  %s2552_s6 = inlined_call_operand.hbm [shape: f32[2,16,128], index: 6, kind: input, shape index: {}]   ;;  %s2553_s7 = inlined_call_operand.hbm [shape: u8[2,3,16,128], index: 7, kind: output, shape index: {}]  }
   0x1   :  { %2564 = sst [smem:[#allocation20_spill]] %s2547_s1 }
   0x2   :  { %2565 = sst [smem:[#allocation21_spill]] %s2549_s3 }
   0x3   :  { %2566 = sst [smem:[#allocation22_spill]] %s2553_s7 }
   0x4   :  { %12 = vsyncpa [#allocation3], 0 }
   0x5   :  { %14 = vsyncpa [#allocation3 + $0x1], 0 }
   0x6   :  { %15 = vsyncpa [#allocation6], 0 }
   0x7   :  { %16 = vsyncpa [#allocation9], 0 }
   0x8   :  { %17 = vsyncpa [#allocation12], 0 }
   0x9   :  { %18 = vsyncpa [#allocation4], 0 }
   0xa   :  { %20 = vsyncpa [#allocation4 + $0x1], 0  ;;  %s2112_s24 = smov 0   ;;  %s2114_s25 = smov 0  }
   0xb   :  { %s2116_s26 = smov 0   ;;  %s2118_s27 = smov 0  }
   0xc   :  { %s2120_s28 = smov 0   ;;  %s2122_s29 = smov 0  }
   0xd LB: > { %s2554_s30 = sadd.s32 4294967295, %s2051_s29   ;;  %p1306_p0 = scmp.ge.s32.totalorder %s2051_s29, 1  ;;  %s2051_s29 = sphi %s2122_s29, %s26_s29   ;;  %s2047_s28 = sphi %s2120_s28, %s2592_s28   ;;  %s2043_s27 = sphi %s2118_s27, %s2591_s27   ;;  %s2039_s26 = sphi %s2116_s26, %s2590_s26   ;;  %s2035_s25 = sphi %s2114_s25, %s2589_s25   ;;  %s2031_s24 = sphi %s2112_s24, %s2588_s24  }
   0xe   : > { %p2146_p1 = scmp.eq.s32.totalorder %s2554_s30, 0  ;;  %p236_p2 = scmp.lt.s32.totalorder %s2051_s29, 3 }
   0xf   : > { %s2053_s10 = smov [#allocation5]   ;;  %s2054_s13 = smov [#allocation8]  }
  0x10   : > { %s2567_s8 = scalar_select %p2146_p1, 1, 0 }
  0x11   : > { %p2151_p3 = pnand %p1306_p0, %p236_p2  ;;  %s248_s11 = sshll.u32 %s2053_s10, 4  ;;  %s2155_s11 = int_to_ptr.vmem [resolvable:$true] %s248_s11 }
  0x12   : > { %s274_s14 = sshll.u32 %s2054_s13, 4  ;;  %s2055_s15 = smov [#allocation11]   ;;  %s2166_s14 = int_to_ptr.vmem [resolvable:$true] %s274_s14 }
  0x13   : > { %s2568_s9 = scalar_select %p2151_p3, 1, 0 }
  0x14   : > { %p1635_p4 = pneg %p2151_p3  ;;  %s2168_s16 = sshll.u32 %s2055_s15, 4  ;;  %s301_s16 = int_to_ptr.vmem [resolvable:$true] %s2168_s16 }
  0x15   : > { %s2570_s1 = sld [smem:[#allocation20_spill]] }
  0x16   : > { %p2162_p6 = pnand %p1635_p4, %p2146_p1 }
  0x18   : > { %p2178_p8 = pneg %p2162_p6 }
  0x1b   : > { %s1759_s19 = scalar_lea.hbm %s2570_s1, 128 }
  0x1c   : > { %p1760_p7 = scmp.ne.s32.totalorder %s2570_s1, %s1759_s19  ;;  %p1766_p11 = scmp.lt.u32.totalorder %s1759_s19, %s2570_s1 }
  0x1e   : > { %p1762_p9 = pnand %p2178_p8, %p1760_p7 }
  0x20   : > { %p1763_p10 = pneg %p1762_p9 }
  0x22   : > { %p1768_p12 = pnand %p1766_p11, %p1763_p10 }
  0x24   : > { %1771 = shalt.err (!%p1768_p12)
}
  0x25   : > { %s1772_s13 = scalar_lea.vmem %s2155_s11, 128  ;;  %p1780_p4 = scmp.lt.s32.totalorder %s2155_s11, %s2155_s11 }
  0x26   : > { %p1773_p13 = scmp.ne.s32.totalorder %s2155_s11, %s1772_s13  ;;  %p1781_p5 = scmp.lt.s32.totalorder %s1772_s13, %s1772_s13 }
  0x28   : > { %p1775_p0 = pnand %p1773_p13, %p2178_p8  ;;  %p1782_p7 = por %p1781_p5, %p1780_p4 }
  0x2a   : > { %p1776_p2 = pneg %p1775_p0 }
  0x2c   : > { %p1783_p9 = pnand %p1782_p7, %p1776_p2 }
  0x2e   : > { %1786 = shalt.err (!%p1783_p9)
}
  0x2f   : > { %s2559_s15 = smov 64   ;;  %s2561_s17 = smov 4  }
  0x30   : > { %1638 = dma.hbm_to_vmem [thread:$0]  (!%p2162_p6), %s2570_s1, 128, %s2155_s11, [#allocation6], %s2559_s15, %s2559_s15, %s2561_s17  }
  0x31   : > { %s2572_s3 = sld [smem:[#allocation21_spill]] }
  0x37   : > { %s1787_s23 = scalar_lea.hbm %s2572_s3, 1024 }
  0x38   : > { %p1788_p5 = scmp.ne.s32.totalorder %s2572_s3, %s1787_s23  ;;  %p1794_p12 = scmp.lt.u32.totalorder %s1787_s23, %s2572_s3 }
  0x3a   : > { %p1790_p10 = pnand %p1788_p5, %p2178_p8 }
  0x3c   : > { %p1791_p11 = pneg %p1790_p10 }
  0x3e   : > { %p1796_p13 = pnand %p1794_p12, %p1791_p11 }
  0x40   : > { %1799 = shalt.err (!%p1796_p13)
}
  0x41   : > { %s1800_s11 = scalar_lea.vmem %s2166_s14, 1024  ;;  %p1808_p7 = scmp.lt.s32.totalorder %s2166_s14, %s2166_s14 }
  0x42   : > { %p1801_p0 = scmp.ne.s32.totalorder %s2166_s14, %s1800_s11  ;;  %p1809_p9 = scmp.lt.s32.totalorder %s1800_s11, %s1800_s11 }
  0x44   : > { %p1803_p2 = pnand %p1801_p0, %p2178_p8  ;;  %p1810_p5 = por %p1809_p9, %p1808_p7 }
  0x46   : > { %p1804_p4 = pneg %p1803_p2 }
  0x48   : > { %p1811_p10 = pnand %p1810_p5, %p1804_p4 }
  0x4a   : > { %1814 = shalt.err (!%p1811_p10)
}
  0x4b   : > { %1644 = dma.hbm_to_vmem [thread:$0]  (!%p2162_p6), %s2572_s3, 1024, %s2166_s14, [#allocation9], %s2559_s15, %s2559_s15, %s2561_s17  }
  0x4c   : > { %s1815_s20 = scalar_lea.hbm %s2551_s5, 512 }
  0x4d   : > { %p1816_p11 = scmp.ne.s32.totalorder %s2551_s5, %s1815_s20  ;;  %p1822_p0 = scmp.lt.u32.totalorder %s1815_s20, %s2551_s5 }
  0x4f   : > { %p1818_p12 = pnand %p1816_p11, %p2178_p8 }
  0x51   : > { %p1819_p13 = pneg %p1818_p12 }
  0x53   : > { %p1824_p2 = pnand %p1822_p0, %p1819_p13 }
  0x55   : > { %1827 = shalt.err (!%p1824_p2)
}
  0x56   : > { %s1828_s11 = scalar_lea.vmem %s301_s16, 512  ;;  %p1836_p5 = scmp.lt.s32.totalorder %s301_s16, %s301_s16 }
  0x57   : > { %p1829_p4 = scmp.ne.s32.totalorder %s301_s16, %s1828_s11  ;;  %p1837_p10 = scmp.lt.s32.totalorder %s1828_s11, %s1828_s11 }
  0x59   : > { %p1831_p7 = pnand %p1829_p4, %p2178_p8  ;;  %p1838_p3 = por %p1837_p10, %p1836_p5 }
  0x5b   : > { %p1832_p9 = pneg %p1831_p7 }
  0x5d   : > { %p1839_p1 = pnand %p1838_p3, %p1832_p9 }
  0x5f   : > { %1842 = shalt.err (!%p1839_p1)
}
  0x60   : > { %s2058_s14 = smov 128   ;;  %s2059_s7 = smov 8  }
  0x61   : > { %1650 = dma.hbm_to_vmem [thread:$0]  (!%p2162_p6), %s2551_s5, 512, %s301_s16, [#allocation12], %s2058_s14, %s2058_s14, %s2059_s7  }
  0x62   : > { %s2060_s19 = smov [#allocation7]   ;;  %s2061_s21 = smov [#allocation10]  }
  0x63   : > { %s261_s20 = sshll.u32 %s2060_s19, 4  ;;  %s287_s23 = sshll.u32 %s2061_s21, 4  ;;  %s262_s20 = int_to_ptr.vmem [resolvable:$true] %s261_s20  ;;  %s288_s23 = int_to_ptr.vmem [resolvable:$true] %s287_s23 }
  0x64   : > { %s1843_s11 = scalar_lea.hbm %s2548_s2, 128 }
  0x65   : > { %p1844_p1 = scmp.ne.s32.totalorder %s2548_s2, %s1843_s11  ;;  %p1850_p12 = scmp.lt.u32.totalorder %s1843_s11, %s2548_s2 }
  0x67   : > { %p1846_p3 = pnand %p1844_p1, %p2178_p8 }
  0x69   : > { %p1847_p11 = pneg %p1846_p3 }
  0x6b   : > { %p1852_p13 = pnand %p1850_p12, %p1847_p11 }
  0x6d   : > { %1855 = shalt.err (!%p1852_p13)
}
  0x6e   : > { %s1856_s16 = scalar_lea.vmem %s262_s20, 128  ;;  %p1864_p7 = scmp.lt.s32.totalorder %s262_s20, %s262_s20 }
  0x6f   : > { %p1857_p0 = scmp.ne.s32.totalorder %s262_s20, %s1856_s16  ;;  %p1865_p9 = scmp.lt.s32.totalorder %s1856_s16, %s1856_s16 }
  0x71   : > { %p1859_p2 = pnand %p1857_p0, %p2178_p8  ;;  %p1866_p5 = por %p1865_p9, %p1864_p7 }
  0x73   : > { %p1860_p4 = pneg %p1859_p2 }
  0x75   : > { %p1867_p10 = pnand %p1866_p5, %p1860_p4 }
  0x77   : > { %1870 = shalt.err (!%p1867_p10)
}
  0x78   : > { %s2573_s15 = smov 4   ;;  %s2574_s17 = smov 64  }
  0x79   : > { %1641 = dma.hbm_to_vmem [thread:$0]  (!%p2162_p6), %s2548_s2, 128, %s262_s20, [#allocation6], %s2574_s17, %s2574_s17, %s2573_s15  }
  0x7a   : > { %s1871_s19 = scalar_lea.hbm %s2550_s4, 1024 }
  0x7b   : > { %p1872_p1 = scmp.ne.s32.totalorder %s2550_s4, %s1871_s19  ;;  %p1878_p12 = scmp.lt.u32.totalorder %s1871_s19, %s2550_s4 }
  0x7d   : > { %p1874_p3 = pnand %p1872_p1, %p2178_p8 }
  0x7f   : > { %p1875_p11 = pneg %p1874_p3 }
  0x81   : > { %p1880_p13 = pnand %p1878_p12, %p1875_p11 }
  0x83   : > { %1883 = shalt.err (!%p1880_p13)
}
  0x84   : > { %s1884_s16 = scalar_lea.vmem %s288_s23, 1024  ;;  %p1892_p7 = scmp.lt.s32.totalorder %s288_s23, %s288_s23 }
  0x85   : > { %p1885_p0 = scmp.ne.s32.totalorder %s288_s23, %s1884_s16  ;;  %p1893_p9 = scmp.lt.s32.totalorder %s1884_s16, %s1884_s16 }
  0x87   : > { %p1887_p2 = pnand %p1885_p0, %p2178_p8  ;;  %p1894_p5 = por %p1893_p9, %p1892_p7 }
  0x89   : > { %p1888_p4 = pneg %p1887_p2 }
  0x8b   : > { %p1895_p10 = pnand %p1894_p5, %p1888_p4 }
  0x8d   : > { %1898 = shalt.err (!%p1895_p10)
}
  0x8e   : > { %1647 = dma.hbm_to_vmem [thread:$0]  (!%p2162_p6), %s2550_s4, 1024, %s288_s23, [#allocation9], %s2574_s17, %s2574_s17, %s2573_s15  }
  0x8f   : > { %s2062_s3 = smov [#allocation13]   ;;  %s1899_s21 = scalar_lea.hbm %s2552_s6, 512 }
  0x90   : > { %s313_s30 = sshll.u32 %s2062_s3, 4  ;;  %p1900_p1 = scmp.ne.s32.totalorder %s2552_s6, %s1899_s21  ;;  %s314_s30 = int_to_ptr.vmem [resolvable:$true] %s313_s30 }
  0x91   : > { %p1906_p12 = scmp.lt.u32.totalorder %s1899_s21, %s2552_s6 }
  0x92   : > { %p1902_p3 = pnand %p1900_p1, %p2178_p8 }
  0x94   : > { %p1903_p11 = pneg %p1902_p3 }
  0x96   : > { %p1908_p13 = pnand %p1906_p12, %p1903_p11 }
  0x98   : > { %1911 = shalt.err (!%p1908_p13)
}
  0x99   : > { %s1912_s23 = scalar_lea.vmem %s314_s30, 512  ;;  %p1920_p7 = scmp.lt.s32.totalorder %s314_s30, %s314_s30 }
  0x9a   : > { %p1913_p0 = scmp.ne.s32.totalorder %s314_s30, %s1912_s23  ;;  %p1921_p9 = scmp.lt.s32.totalorder %s1912_s23, %s1912_s23 }
  0x9c   : > { %p1915_p2 = pnand %p1913_p0, %p2178_p8  ;;  %p1922_p5 = por %p1921_p9, %p1920_p7 }
  0x9e   : > { %p1916_p4 = pneg %p1915_p2 }
  0xa0   : > { %p1923_p10 = pnand %p1922_p5, %p1916_p4 }
  0xa2   : > { %1926 = shalt.err (!%p1923_p10)
}
  0xa3   : > { %1653 = dma.hbm_to_vmem [thread:$0]  (!%p2162_p6), %s2552_s6, 512, %s314_s30, [#allocation12], %s2058_s14, %s2058_s14, %s2059_s7  }
  0xa4   : > { %s1305_s12 = sadd.s32 4294967294, %s2051_s29   ;;  %s45_s22 = sadd.s32 1, %s2047_s28 }
  0xa5   : > { %p47_p8 = scmp.ge.s32.totalorder %s45_s22, 2  ;;  %s56_s20 = sadd.s32 1, %s2039_s26 }
  0xa6   : > { %p63_p1 = scmp.ne.s32.totalorder %s2039_s26, %s2035_s25  ;;  %p64_p3 = scmp.eq.s32.totalorder %s2051_s29, 0 }
  0xa7   : > { %s2594_s22 = smov (%p47_p8, %s45_s22), 0  ;;  %p69_p12 = scmp.ne.s32.totalorder %s2035_s25, %s2031_s24 }
  0xa8   : > { %p2321_p11 = por %p64_p3, %p63_p1  ;;  %s49_s14 = ssub.s32 %s2047_s28, %s2594_s22 }
  0xa9   : > { %s2576_s7 = sadd.s32 4294967295, %s2051_s29   ;;  %p54_p13 = scmp.eq.s32.totalorder %s49_s14, 0 }
  0xaa   : > { %p223_p6 = scmp.eq.s32.totalorder %s2576_s7, 1  ;;  %p2577_p0 = scmp.ne.s32.totalorder %s2567_s8, 0 }
  0xab   : > { %p229_p7 = scmp.eq.s32.totalorder %s1305_s12, 1  ;;  %p1668_p5 = scmp.lt.s32.totalorder %s2051_s29, 2 }
  0xac   : > { %p2333_p2 = por %p2577_p0, %p69_p12  ;;  %p2337_p4 = por %p223_p6, %p63_p1 }
  0xad   : > { %s2342_s18 = scalar_select %p54_p13, %s2039_s26, %s56_s20  }
  0xae   : > { %s2579_s30 = scalar_select %p2337_p4, 1, 0 }
  0xaf   : > { %p2344_p9 = por %p229_p7, %p69_p12  ;;  %s327_s21 = sand.u32 1, %s2039_s26  }
  0xb0   : > { %s1580_s10 = smul.u32 192, %s2047_s28  ;;  %p2358_p10 = pnand %p1668_p5, %p2321_p11 }
  0xb1   : > { %s2580_s19 = scalar_select %p2344_p9, 1, 0 }
  0xb2   : > { %s1579_s13 = smul.u32 12, %s327_s21  ;;  %s2354_s23 = scalar_lea.hbm %s2546_s0, %s1580_s10 }
  0xb3   : > { %s2364_s20 = scalar_lea.sflag [#allocation3], %s327_s21  ;;  %s1927_s14 = scalar_lea.hbm %s2354_s23, 192 }
  0xb4   : > { %s331_s17 = scalar_lea.vmem [#allocation2], %s1579_s13  ;;  %p1928_p8 = scmp.ne.s32.totalorder %s2354_s23, %s1927_s14 }
  0xb5   : > { %s341_s12 = sshll.u32 %s331_s17, 4  ;;  %p1929_p1 = pneg %p2358_p10  ;;  %s2362_s12 = int_to_ptr.vmem [resolvable:$true] %s341_s12 }
  0xb6   : > { %s1932_s10 = scalar_lea.hbm %s2546_s0, 384  ;;  %p1933_p11 = scmp.lt.u32.totalorder %s2354_s23, %s2546_s0 }
  0xb7   : > { %p1930_p3 = pnand %p1929_p1, %p1928_p8  ;;  %p1934_p6 = scmp.lt.u32.totalorder %s1932_s10, %s1927_s14 }
  0xb8   : > { %p1936_p0 = scmp.lt.u32.totalorder %s1927_s14, %s2354_s23 }
  0xb9   : > { %p1931_p12 = pneg %p1930_p3  ;;  %p1935_p13 = por %p1934_p6, %p1933_p11 }
  0xbb   : > { %p1937_p7 = por %p1936_p0, %p1935_p13 }
  0xbd   : > { %p1938_p5 = pnand %p1937_p7, %p1931_p12 }
  0xbf   : > { %1941 = shalt.err (!%p1938_p5)
}
  0xc0   : > { %s1942_s21 = scalar_lea.vmem %s2362_s12, 192  ;;  %s2063_s13 = smov [#allocation2]  }
  0xc1   : > { %p1943_p8 = scmp.ne.s32.totalorder %s2362_s12, %s1942_s21  ;;  %s1947_s17 = sshll.u32 %s2063_s13, 4  ;;  %s1948_s17 = int_to_ptr.vmem [resolvable:$false] %s1947_s17 }
  0xc2   : > { %s1949_s1 = scalar_lea.vmem %s1948_s17, 384  ;;  %p1950_p4 = scmp.lt.s32.totalorder %s2362_s12, %s1948_s17 }
  0xc3   : > { %p1945_p3 = pnand %p1943_p8, %p1929_p1  ;;  %p1951_p11 = scmp.lt.s32.totalorder %s1949_s1, %s1942_s21 }
  0xc5   : > { %p1946_p9 = pneg %p1945_p3  ;;  %p1952_p6 = por %p1951_p11, %p1950_p4 }
  0xc7   : > { %p1953_p13 = pnand %p1952_p6, %p1946_p9 }
  0xc9   : > { %1956 = shalt.err (!%p1953_p13)
}
  0xca   : > { %s2064_s14 = smov 32   ;;  %s2065_s7 = smov 2  }
  0xcb   : > { %1657 = dma.hbm_to_vmem [thread:$0]  (!%p2358_p10), %s2354_s23, 192, %s2362_s12, %s2364_s20, %s2064_s14, %s2064_s14, %s2065_s7  }
  0xcc   : > { %p2582_p1 = scmp.ne.s32.totalorder %s2568_s9, 0 }
  0xcd   : > { %s2395_s10 = sand.u32 (!%p2582_p1), 1, %s2035_s25  }
  0xce   : > { %353 = sbr.rel (%p2582_p1) target bundleno = 1181 (0x49d), region = 48  ;;  %s356_s16 = scalar_lea.sflag (!%p2582_p1), [#allocation3], %s2395_s10 }
  0xcf   : > { %s1581_s11 = smul.u32 (!%p2582_p1), 12, %s2395_s10 }
  0xd1   : > { %s359_s21 = scalar_lea.vmem (!%p2582_p1), [#allocation2], %s1581_s11 }
  0xd5   : > { %2010 = dma.done.wait (%p2333_p2), %s356_s16, 192  }
  0xd6   : > { %2012 = vsyncadd (%p2333_p2), %s356_s16, 4294967104  ;;  %p2583_p4 = scmp.ne.s32.totalorder %s2567_s8, 0 }
  0xd8   : > { %2014 = dma.done.wait (%p2583_p4), [#allocation6], 256  }
  0xd9   : > { %2016 = vsyncadd (%p2583_p4), [#allocation6], 4294967040 }
  0xda   : > { %2018 = dma.done.wait (%p2583_p4), [#allocation9], 2048  }
  0xdb   : > { %2020 = vsyncadd (%p2583_p4), [#allocation9], 4294965248 }
  0xdc   : > { %2022 = dma.done.wait (%p2583_p4), [#allocation12], 1024  }
  0xdd   : > { %2024 = vsyncadd (%p2583_p4), [#allocation12], 4294966272  ;;  %v2066_v0 = vmov 0   ;;  %v2067_v1 = vmov 0.0   ;;  %vm2068_vm0 = vmmov 0   ;;  %v1376_v2 = vld [vmem:[%s359_s21] sm:$0xff]  }
  0xde   : > { %565 = vmatprep.mubr.bf16.mxu0 %v2066_v0  ;;  %1445 = vmatprep.subr.bf16.mxu1 %v2067_v1  ;;  %v1578_v3 = vld [vmem:[%s359_s21 + $0x8] sm:$0xf]   ;;  %v1377_v4 = vunpack.c.0.s8 %v1376_v2  ;;  %v1378_v5 = vunpack.c.1.s8 %v1376_v2  ;;  %v1381_v6 = vunpack.c.2.s8 %v1376_v2  ;;  %v1382_v7 = vunpack.c.3.s8 %v1376_v2  ;;  %v1741_v53 = vld [vmem:[#allocation5] sm:$0xff]   ;;  %v1745_v61 = vld [vmem:[#allocation10 + $0x18] sm:$0xff]   ;;  %s1606_s8 = smul.u32 192, %s2043_s27  ;;  %s413_s9 = scalar_lea.vmem [#allocation14], %s1581_s11 }
  0xdf   : > { %1447 = vmatprep.mubr.msk.bf16.mxu1 %vm2068_vm0, %v2067_v1  ;;  %v1385_v8 = vunpack.c.0.s8 %v1578_v3  ;;  %v1386_v9 = vunpack.c.1.s8 %v1578_v3  ;;  %vm529_vm1 = vcmask 130048   ;;  %v1742_v57 = vld [vmem:[#allocation10] sm:$0xff]   ;;  %v1743_v59 = vld [vmem:[#allocation10 + $0x8] sm:$0xff]   ;;  %v1744_v60 = vld [vmem:[#allocation10 + $0x10] sm:$0xff]   ;;  %s1155_s3 = sshll.u32 %s413_s9, 4  ;;  %s2584_s12 = sld [smem:[#allocation22_spill]]  ;;  %s2497_s3 = int_to_ptr.vmem [resolvable:$true] %s1155_s3 }
  0xe0   : > { %v473_v10 = vand.u32 255, %v1377_v4  ;;  %v474_v11 = vand.u32 255, %v1378_v5  ;;  %v479_v12 = vand.u32 255, %v1381_v6  ;;  %v480_v13 = vand.u32 255, %v1382_v7  ;;  %v1746_v62 = vld [vmem:[#allocation10 + $0x20] sm:$0xff]   ;;  %v1747_v63 = vld [vmem:[#allocation10 + $0x28] sm:$0xff]  }
  0xe1   : > { %v485_v14 = vand.u32 255, %v1385_v8  ;;  %v486_v15 = vand.u32 255, %v1386_v9  ;;  %v1748_v2 = vld [vmem:[#allocation10 + $0x30] sm:$0xff]   ;;  %v1749_v3 = vld [vmem:[#allocation10 + $0x38] sm:$0xff]   ;;  %s1139_s27 = scalar_lea.sflag [#allocation4], %s2395_s10  ;;  %s1957_s13 = scalar_lea.vmem %s2497_s3, 192 }
  0xe2   : > { %v475_v16 = vcvt.s32.f32 %v473_v10  ;;  %v476_v17 = vcvt.s32.f32 %v474_v11  ;;  %v481_v18 = vcvt.s32.f32 %v479_v12  ;;  %v482_v19 = vcvt.s32.f32 %v480_v13  ;;  %p1958_p2 = scmp.ne.s32.totalorder %s2497_s3, %s1957_s13  ;;  %p2585_p9 = scmp.ne.s32.totalorder %s2579_s30, 0 }
  0xe3   : > { %v487_v20 = vcvt.s32.f32 %v485_v14  ;;  %v488_v21 = vcvt.s32.f32 %v486_v15  ;;  %v453_v15 = vld [vmem:[#allocation11] sm:$0xff]  ;;  %s2069_s17 = smov [#allocation14]  }
  0xe4   : > { %v501_v22 = vmul.f32 -0.168736, %v475_v16  ;;  %v502_v23 = vmul.f32 -0.168736, %v476_v17  ;;  %v503_v24 = vmul.f32 0.331264, %v481_v18  ;;  %p1959_p10 = pnand %p1958_p2, %p2585_p9 }
  0xe5   : > { %v504_v25 = vmul.f32 0.331264, %v482_v19  ;;  %v507_v26 = vmul.f32 0.5, %v487_v20  ;;  %v508_v27 = vmul.f32 0.5, %v488_v21  ;;  %v489_v28 = vmul.f32 0.299, %v475_v16  ;;  %s2495_s20 = scalar_lea.hbm %s2584_s12, %s1606_s8 }
  0xe6   : > { %v505_v29 = vsub.f32 %v501_v22, %v503_v24  ;;  %v490_v30 = vmul.f32 0.299, %v476_v17  ;;  %v491_v31 = vmul.f32 0.587, %v481_v18  ;;  %v492_v32 = vmul.f32 0.587, %v482_v19  ;;  %p1960_p12 = pneg %p1959_p10 }
  0xe7   : > { %v506_v33 = vsub.f32 %v502_v23, %v504_v25  ;;  %v495_v34 = vmul.f32 0.114, %v487_v20  ;;  %v496_v35 = vmul.f32 0.114, %v488_v21  ;;  %v511_v36 = vmul.f32 0.5, %v475_v16  ;;  %v456_v16 = vld [vmem:[#allocation11 + $0x10] sm:$0xff] }
  0xe8   : > { %v509_v37 = vadd.f32 %v507_v26, %v505_v29  ;;  %v493_v38 = vadd.f32 %v491_v31, %v489_v28  ;;  %v494_v39 = vadd.f32 %v492_v32, %v490_v30  ;;  %v512_v40 = vmul.f32 0.5, %v476_v17  ;;  %v457_v22 = vld [vmem:[#allocation11 + $0x18] sm:$0xff]  ;;  %v458_v30 = vld [vmem:[#allocation13] sm:$0xff]  ;;  %v459_v32 = vld [vmem:[#allocation13 + $0x8] sm:$0xff]  ;;  %s1961_s1 = sshll.u32 %s2069_s17, 4  ;;  %s1962_s1 = int_to_ptr.vmem [resolvable:$false] %s1961_s1 }
  0xe9   : > { %v510_v41 = vadd.f32 %v508_v27, %v506_v33  ;;  %v513_v42 = vmul.f32 0.418688, %v481_v18  ;;  %v514_v43 = vmul.f32 0.418688, %v482_v19  ;;  %v517_v44 = vmul.f32 0.081312, %v487_v20  ;;  %p1964_p0 = scmp.lt.s32.totalorder %s2497_s3, %s1962_s1 }
  0xea   : > { %v497_v45 = vadd.f32 %v495_v34, %v493_v38  ;;  %v498_v46 = vadd.f32 %v496_v35, %v494_v39  ;;  %v518_v47 = vmul.f32 0.081312, %v488_v21  ;;  %v454_v18 = vld [vmem:[#allocation11 + $0x8] sm:$0xff]  ;;  %v461_v34 = vld [vmem:[#allocation13 + $0x10] sm:$0xff]  ;;  %s1963_s14 = scalar_lea.vmem %s1962_s1, 384 }
  0xeb   : > { %v522_v48 = vpack.c.bf16 %v510_v41, %v509_v37  ;;  %v515_v49 = vsub.f32 %v511_v36, %v513_v42  ;;  %v516_v50 = vsub.f32 %v512_v40, %v514_v43  ;;  %v462_v36 = vld [vmem:[#allocation13 + $0x18] sm:$0xff]  ;;  %p1965_p7 = scmp.lt.s32.totalorder %s1963_s14, %s1957_s13 }
  0xec   : > { %v1326_v51 = vadd.f32 -128.0, %v497_v45  ;;  %v1327_v52 = vadd.f32 -128.0, %v498_v46  ;;  %v1751_v45 = vld [vmem:[#allocation8] sm:$0xff]   ;;  %v1752_v46 = vld [vmem:[#allocation8 + $0x8] sm:$0xff]  }
  0xed   : > { %533 = vmatprep.subr.bf16.mxu0 %v522_v48  ;;  %v519_v54 = vsub.f32 %v515_v49, %v517_v44  ;;  %v520_v55 = vsub.f32 %v516_v50, %v518_v47  ;;  %v1750_v44 = vld [vmem:[#allocation7] sm:$0xff]   ;;  %v1753_v47 = vld [vmem:[#allocation8 + $0x10] sm:$0xff]   ;;  %v1755_v49 = vld [vmem:[#allocation8 + $0x20] sm:$0xff]   ;;  %p1966_p5 = por %p1965_p7, %p1964_p0 }
  0xee   : > { %v521_v56 = vpack.c.bf16 %v1327_v52, %v1326_v51  ;;  %v1754_v48 = vld [vmem:[#allocation8 + $0x18] sm:$0xff]  }
  0xef   : > { %v523_v58 = vpack.c.bf16 %v520_v55, %v519_v54  ;;  %p1967_p8 = pnand %p1966_p5, %p1960_p12 }
  0xf0   : > { %534 = vmatpush1.bf16.msra.mxu0 %v521_v56 }
  0xf1   : > { %1446 = vmatpush3.bf16.msra.mxu1 %v523_v58  ;;  %1451 = vmatprep.subr.bf16.mxu0 %v2067_v1 }
  0xf2   : > { %1471 = vmatprep.subr.bf16.mxu1 %v2067_v1 }
  0xf3   : > { %1329 = vmatmul.mubr.msk.bf16.vlgmr.msra.gmra.mrb[0].mxu0 %vm529_vm1, %v1741_v53 }
  0xf4   : > { %1448 = vmatmul.mubr.msk.bf16.vlgmr.msra.gmra.mrb[0].mxu1 %vm529_vm1, %v1741_v53  ;;  %1452 = vmatpush3.bf16.msra.mxu0 %v1742_v57 }
  0xf5   : > { %1472 = vmatpush3.bf16.msra.mxu1 %v1742_v57  ;;  %1453 = vmatprep.subr.bf16.mxu0 %v2067_v1 }
  0xf6   : > { %1473 = vmatprep.subr.bf16.mxu1 %v2067_v1  ;;  %1467 = vmatprep.mubr.msk.bf16.mxu0 %vm2068_vm0, %v2067_v1 }
  0xf7   : > { %1487 = vmatprep.mubr.msk.bf16.mxu1 %vm2068_vm0, %v2067_v1 }
  0xf8   : > { %1454 = vmatpush3.bf16.msra.mxu0 %v1743_v59 }
  0xf9   : > { %1474 = vmatpush3.bf16.msra.mxu1 %v1743_v59  ;;  %1455 = vmatprep.subr.bf16.mxu0 %v2067_v1 }
  0xfa   : > { %1475 = vmatprep.subr.bf16.mxu1 %v2067_v1 }
  0xfc   : > { %1456 = vmatpush3.bf16.msra.mxu0 %v1744_v60 }
  0xfd   : > { %1476 = vmatpush3.bf16.msra.mxu1 %v1744_v60  ;;  %1457 = vmatprep.subr.bf16.mxu0 %v2067_v1 }
  0xfe   : > { %1477 = vmatprep.subr.bf16.mxu1 %v2067_v1 }
 0x100   : > { %1458 = vmatpush3.bf16.msra.mxu0 %v1745_v61 }
 0x101   : > { %1478 = vmatpush3.bf16.msra.mxu1 %v1745_v61  ;;  %1459 = vmatprep.subr.bf16.mxu0 %v2067_v1 }
 0x102   : > { %1479 = vmatprep.subr.bf16.mxu1 %v2067_v1 }
 0x104   : > { %1460 = vmatpush3.bf16.msra.mxu0 %v1746_v62 }
 0x105   : > { %1480 = vmatpush3.bf16.msra.mxu1 %v1746_v62  ;;  %1461 = vmatprep.subr.bf16.mxu0 %v2067_v1 }
 0x106   : > { %1481 = vmatprep.subr.bf16.mxu1 %v2067_v1 }
 0x108   : > { %1462 = vmatpush3.bf16.msra.mxu0 %v1747_v63 }
 0x109   : > { %1482 = vmatpush3.bf16.msra.mxu1 %v1747_v63  ;;  %1463 = vmatprep.subr.bf16.mxu0 %v2067_v1 }
 0x10a   : > { %1483 = vmatprep.subr.bf16.mxu1 %v2067_v1 }
 0x10c   : > { %1464 = vmatpush3.bf16.msra.mxu0 %v1748_v2 }
 0x10d   : > { %1484 = vmatpush3.bf16.msra.mxu1 %v1748_v2  ;;  %1465 = vmatprep.subr.bf16.mxu0 %v2067_v1 }
 0x10e   : > { %1485 = vmatprep.subr.bf16.mxu1 %v2067_v1 }
 0x110   : > { %1466 = vmatpush3.bf16.msra.mxu0 %v1749_v3 }
 0x111   : > { %1486 = vmatpush3.bf16.msra.mxu1 %v1749_v3  ;;  %1491 = vmatprep.subr.bf16.mxu0 %v2067_v1 }
 0x112   : > { %1511 = vmatprep.subr.bf16.mxu1 %v2067_v1 }
 0x1c6   : > { %v567_v4 = vpop.f32.mrb[0].mxu0 }
 0x1c7   : > { %v569_v5 = vpop.f32.mrb[1].mxu0  ;;  %v610_v6 = vpop.f32.mrb[0].mxu1 }
 0x1c8   : > { %v571_v7 = vpop.f32.mrb[2].mxu0  ;;  %v1449_v8 = vpop.f32.mrb[1].mxu1 }
 0x1c9   : > { %v617_v9 = vpack.c.bf16 %v571_v7, %v567_v4  ;;  %v573_v10 = vpop.f32.mrb[3].mxu0  ;;  %v613_v11 = vpop.f32.mrb[2].mxu1 }
 0x1ca   : > { %v713_v12 = vpack.c.bf16 %v573_v10, %v569_v5  ;;  %v761_v13 = vpack.c.bf16 %v613_v11, %v610_v6  ;;  %v1450_v14 = vpop.f32.mrb[3].mxu1 }
 0x1cb   : > { %1468 = vmatmul.mubr.bf16.vlgmr.msra.gmra.mrb[4].mxu0 %v617_v9 }
 0x1cc   : > { %1492 = vmatpush3.bf16.msra.mxu0 %v1742_v57  ;;  %1488 = vmatmul.mubr.bf16.vlgmr.msra.gmra.mrb[4].mxu1 %v713_v12  ;;  %v1756_v57 = vld [vmem:[#allocation8 + $0x28] sm:$0xff]  }
 0x1cd   : > { %1493 = vmatprep.subr.bf16.mxu0 %v2067_v1  ;;  %1507 = vmatprep.mubr.msk.bf16.mxu0 %vm2068_vm0, %v2067_v1 }
 0x1ce   : > { %1513 = vmatprep.mubr.msk.bf16.mxu1 %vm2068_vm0, %v2067_v1 }
 0x1d0   : > { %1494 = vmatpush3.bf16.msra.mxu0 %v1743_v59 }
 0x1d1   : > { %1495 = vmatprep.subr.bf16.mxu0 %v2067_v1 }
 0x1d4   : > { %1496 = vmatpush3.bf16.msra.mxu0 %v1744_v60 }
 0x1d5   : > { %1497 = vmatprep.subr.bf16.mxu0 %v2067_v1 }
 0x1d8   : > { %1498 = vmatpush3.bf16.msra.mxu0 %v1745_v61  ;;  %v1757_v61 = vld [vmem:[#allocation8 + $0x30] sm:$0xff]  }
 0x1d9   : > { %1499 = vmatprep.subr.bf16.mxu0 %v2067_v1 }
 0x1dc   : > { %1500 = vmatpush3.bf16.msra.mxu0 %v1746_v62 }
 0x1dd   : > { %1501 = vmatprep.subr.bf16.mxu0 %v2067_v1 }
 0x1e0   : > { %1502 = vmatpush3.bf16.msra.mxu0 %v1747_v63  ;;  %v1758_v63 = vld [vmem:[#allocation8 + $0x38] sm:$0xff]  }
 0x1e1   : > { %1503 = vmatprep.subr.bf16.mxu0 %v2067_v1 }
 0x1e4   : > { %1504 = vmatpush3.bf16.msra.mxu0 %v1748_v2 }
 0x1e5   : > { %1505 = vmatprep.subr.bf16.mxu0 %v2067_v1 }
 0x1e8   : > { %1506 = vmatpush3.bf16.msra.mxu0 %v1749_v3 }
 0x1eb   : > { %1508 = vmatmul.mubr.bf16.vlgmr.msra.gmra.mrb[8].mxu0 %v761_v13 }
 0x1ec   : > { %852 = vmatprep.mubr.bf16.mxu0 %v2066_v0 }
 0x29e   : > { %v700_v17 = vpop.f32.mrb[4].mxu0 }
 0x29f   : > { %v707_v19 = vmul.f32 %v700_v17, %v453_v15  ;;  %v1469_v20 = vpop.f32.mrb[5].mxu0  ;;  %v748_v21 = vpop.f32.mrb[4].mxu1 }
 0x2a0   : > { %v755_v23 = vmul.f32 %v748_v21, %v456_v16  ;;  %v703_v24 = vpop.f32.mrb[6].mxu0  ;;  %v1489_v25 = vpop.f32.mrb[5].mxu1 }
 0x2a1   : > { %v1582_v26 = vround.rtne.f32 %v707_v19  ;;  %v708_v27 = vmul.f32 %v703_v24, %v454_v18  ;;  %v1470_v28 = vpop.f32.mrb[7].mxu0  ;;  %v751_v29 = vpop.f32.mrb[6].mxu1 }
 0x2a2   : > { %v1584_v31 = vround.rtne.f32 %v755_v23  ;;  %v756_v33 = vmul.f32 %v751_v29, %v457_v22  ;;  %v1490_v0 = vpop.f32.mrb[7].mxu1 }
 0x2a3   : > { %v1583_v35 = vround.rtne.f32 %v708_v27  ;;  %v711_v38 = vmul.f32 %v1582_v26, %v458_v30 }
 0x2a4   : > { %v1585_v37 = vround.rtne.f32 %v756_v33  ;;  %v759_v40 = vmul.f32 %v1584_v31, %v461_v34 }
 0x2a5   : > { %v712_v39 = vmul.f32 %v1583_v35, %v459_v32 }
 0x2a6   : > { %v760_v41 = vmul.f32 %v1585_v37, %v462_v36 }
 0x2a7   : > { %v809_v42 = vpack.c.bf16 %v712_v39, %v711_v38 }
 0x2a8   : > { %v810_v43 = vpack.c.bf16 %v760_v41, %v759_v40 }
 0x2aa   : > { %820 = vmatprep.subr.bf16.mxu0 %v810_v43 }
 0x2ab   : > { %821 = vmatpush1.bf16.msra.mxu0 %v809_v42 }
 0x2ac   : > { %1537 = vmatprep.subr.bf16.mxu0 %v2067_v1 }
 0x2ae   : > { %1340 = vmatmul.mubr.msk.bf16.vlgmr.msra.gmra.mrb[12].mxu0 %vm529_vm1, %v1750_v44 }
 0x2af   : > { %1538 = vmatpush3.bf16.msra.mxu0 %v1751_v45  ;;  %1553 = vmatprep.mubr.msk.bf16.mxu0 %vm2068_vm0, %v2067_v1 }
 0x2b0   : > { %1539 = vmatprep.subr.bf16.mxu0 %v2067_v1 }
 0x2b3   : > { %1540 = vmatpush3.bf16.msra.mxu0 %v1752_v46 }
 0x2b4   : > { %1541 = vmatprep.subr.bf16.mxu0 %v2067_v1 }
 0x2b7   : > { %1542 = vmatpush3.bf16.msra.mxu0 %v1753_v47 }
 0x2b8   : > { %1543 = vmatprep.subr.bf16.mxu0 %v2067_v1 }
 0x2bb   : > { %1544 = vmatpush3.bf16.msra.mxu0 %v1754_v48 }
 0x2bc   : > { %1545 = vmatprep.subr.bf16.mxu0 %v2067_v1 }
 0x2be   : > { %v796_v50 = vpop.f32.mrb[8].mxu0 }
 0x2bf   : > { %v803_v51 = vmul.f32 %v796_v50, %v456_v16  ;;  %v1509_v52 = vpop.f32.mrb[9].mxu0  ;;  %1546 = vmatpush3.bf16.msra.mxu0 %v1755_v49 }
 0x2c0   : > { %v799_v53 = vpop.f32.mrb[10].mxu0  ;;  %1547 = vmatprep.subr.bf16.mxu0 %v2067_v1 }
 0x2c1   : > { %v1586_v54 = vround.rtne.f32 %v803_v51  ;;  %v804_v55 = vmul.f32 %v799_v53, %v457_v22  ;;  %v1510_v56 = vpop.f32.mrb[11].mxu0 }
 0x2c3   : > { %v807_v58 = vmul.f32 %v1586_v54, %v461_v34  ;;  %v1587_v59 = vround.rtne.f32 %v804_v55  ;;  %1548 = vmatpush3.bf16.msra.mxu0 %v1756_v57 }
 0x2c4   : > { %1549 = vmatprep.subr.bf16.mxu0 %v2067_v1 }
 0x2c5   : > { %v808_v60 = vmul.f32 %v1587_v59, %v462_v36 }
 0x2c7   : > { %v811_v62 = vpack.c.bf16 %v808_v60, %v807_v58  ;;  %1550 = vmatpush3.bf16.msra.mxu0 %v1757_v61 }
 0x2c8   : > { %1551 = vmatprep.subr.bf16.mxu0 %v2067_v1 }
 0x2c9   : > { %1512 = vmatpush3.bf16.msra.mxu1 %v811_v62 }
 0x2ca   : > { %1517 = vmatprep.subr.bf16.mxu1 %v2067_v1 }
 0x2cb   : > { %1552 = vmatpush3.bf16.msra.mxu0 %v1758_v63 }
 0x2cc   : > { %1514 = vmatmul.mubr.msk.bf16.vlgmr.msra.gmra.mrb[8].mxu1 %vm529_vm1, %v1750_v44 }
 0x2cd   : > { %1518 = vmatpush3.bf16.msra.mxu1 %v1751_v45  ;;  %1533 = vmatprep.mubr.msk.bf16.mxu1 %vm2068_vm0, %v2067_v1 }
 0x2ce   : > { %1519 = vmatprep.subr.bf16.mxu1 %v2067_v1 }
 0x2d1   : > { %1520 = vmatpush3.bf16.msra.mxu1 %v1752_v46 }
 0x2d2   : > { %1521 = vmatprep.subr.bf16.mxu1 %v2067_v1 }
 0x2d5   : > { %1522 = vmatpush3.bf16.msra.mxu1 %v1753_v47 }
 0x2d6   : > { %1523 = vmatprep.subr.bf16.mxu1 %v2067_v1 }
 0x2d9   : > { %1524 = vmatpush3.bf16.msra.mxu1 %v1754_v48 }
 0x2da   : > { %1525 = vmatprep.subr.bf16.mxu1 %v2067_v1 }
 0x2dd   : > { %1526 = vmatpush3.bf16.msra.mxu1 %v1755_v49 }
 0x2de   : > { %1527 = vmatprep.subr.bf16.mxu1 %v2067_v1 }
 0x2e1   : > { %1528 = vmatpush3.bf16.msra.mxu1 %v1756_v57 }
 0x2e2   : > { %1529 = vmatprep.subr.bf16.mxu1 %v2067_v1 }
 0x2e5   : > { %1530 = vmatpush3.bf16.msra.mxu1 %v1757_v61 }
 0x2e6   : > { %1531 = vmatprep.subr.bf16.mxu1 %v2067_v1 }
 0x2e9   : > { %1532 = vmatpush3.bf16.msra.mxu1 %v1758_v63 }
 0x2ea   : > { %1557 = vmatprep.subr.bf16.mxu1 %v2067_v1 }
 0x381   : > { %v854_v2 = vpop.f32.mrb[12].mxu0 }
 0x382   : > { %v856_v3 = vpop.f32.mrb[13].mxu0 }
 0x383   : > { %v858_v4 = vpop.f32.mrb[14].mxu0 }
 0x384   : > { %v904_v5 = vpack.c.bf16 %v858_v4, %v854_v2  ;;  %v860_v6 = vpop.f32.mrb[15].mxu0 }
 0x385   : > { %v905_v7 = vpack.c.bf16 %v860_v6, %v856_v3 }
 0x387   : > { %1534 = vmatmul.mubr.bf16.vlgmr.msra.gmra.mrb[12].mxu1 %v905_v7 }
 0x388   : > { %1558 = vmatpush3.bf16.msra.mxu1 %v1751_v45  ;;  %1573 = vmatprep.mubr.msk.bf16.mxu1 %vm2068_vm0, %v2067_v1 }
 0x389   : > { %1559 = vmatprep.subr.bf16.mxu1 %v2067_v1 }
 0x38c   : > { %1560 = vmatpush3.bf16.msra.mxu1 %v1752_v46 }
 0x38d   : > { %1561 = vmatprep.subr.bf16.mxu1 %v2067_v1 }
 0x390   : > { %1562 = vmatpush3.bf16.msra.mxu1 %v1753_v47 }
 0x391   : > { %1563 = vmatprep.subr.bf16.mxu1 %v2067_v1 }
 0x394   : > { %1564 = vmatpush3.bf16.msra.mxu1 %v1754_v48 }
 0x395   : > { %1565 = vmatprep.subr.bf16.mxu1 %v2067_v1 }
 0x398   : > { %1566 = vmatpush3.bf16.msra.mxu1 %v1755_v49 }
 0x399   : > { %1567 = vmatprep.subr.bf16.mxu1 %v2067_v1 }
 0x39c   : > { %1568 = vmatpush3.bf16.msra.mxu1 %v1756_v57 }
 0x39d   : > { %1569 = vmatprep.subr.bf16.mxu1 %v2067_v1 }
 0x39f   : > { %v897_v8 = vpop.f32.mrb[8].mxu1 }
 0x3a0   : > { %1570 = vmatpush3.bf16.msra.mxu1 %v1757_v61  ;;  %v1515_v9 = vpop.f32.mrb[9].mxu1 }
 0x3a1   : > { %1571 = vmatprep.subr.bf16.mxu1 %v2067_v1  ;;  %v900_v10 = vpop.f32.mrb[10].mxu1 }
 0x3a2   : > { %v995_v11 = vpack.c.bf16 %v900_v10, %v897_v8  ;;  %v1516_v12 = vpop.f32.mrb[11].mxu1 }
 0x3a4   : > { %1572 = vmatpush3.bf16.msra.mxu1 %v1758_v63  ;;  %1554 = vmatmul.mubr.bf16.vlgmr.msra.gmra.mrb[16].mxu0 %v995_v11 }
 0x3a7   : > { %1574 = vmatmul.mubr.bf16.vlgmr.msra.gmra.mrb[16].mxu1 %v904_v5 }
 0x45a   : > { %v988_v13 = vpop.f32.mrb[12].mxu1 }
 0x45b   : > { %v1535_v14 = vpop.f32.mrb[13].mxu1  ;;  %v1096_v23 = vmul.f32 0.344136, %v988_v13  ;;  %v1119_v24 = vmul.f32 1.772, %v988_v13 }
 0x45c   : > { %v991_v15 = vpop.f32.mrb[14].mxu1 }
 0x45d   : > { %v1536_v16 = vpop.f32.mrb[15].mxu1  ;;  %v1097_v0 = vmul.f32 0.344136, %v991_v15  ;;  %v1120_v34 = vmul.f32 1.772, %v991_v15 }
 0x477   : > { %v1030_v17 = vpop.f32.mrb[16].mxu0 }
 0x478   : > { %v1555_v18 = vpop.f32.mrb[17].mxu0  ;;  %v1078_v19 = vmul.f32 1.402, %v1030_v17  ;;  %v1100_v26 = vmul.f32 0.714136, %v1030_v17 }
 0x479   : > { %v1033_v20 = vpop.f32.mrb[18].mxu0 }
 0x47a   : > { %v1071_v21 = vpop.f32.mrb[16].mxu1  ;;  %v1556_v22 = vpop.f32.mrb[19].mxu0  ;;  %v1079_v27 = vmul.f32 1.402, %v1033_v20  ;;  %v1101_v39 = vmul.f32 0.714136, %v1033_v20 }
 0x47b   : > { %v1072_v25 = vadd.f32 128.0, %v1071_v21  ;;  %v1575_v1 = vpop.f32.mrb[17].mxu1 }
 0x47c   : > { %v1074_v28 = vpop.f32.mrb[18].mxu1 }
 0x47d   : > { %v1080_v29 = vadd.f32 %v1078_v19, %v1072_v25  ;;  %v1098_v30 = vsub.f32 %v1072_v25, %v1096_v23  ;;  %v1121_v31 = vadd.f32 %v1119_v24, %v1072_v25  ;;  %v1075_v32 = vadd.f32 128.0, %v1074_v28  ;;  %v1576_v33 = vpop.f32.mrb[19].mxu1 }
 0x47f   : > { %v1350_v35 = vmax.f32 %v1080_v29, 0.0  ;;  %v1102_v36 = vsub.f32 %v1098_v30, %v1100_v26  ;;  %v1364_v37 = vmax.f32 %v1121_v31, 0.0  ;;  %v1081_v38 = vadd.f32 %v1079_v27, %v1075_v32 }
 0x480   : > { %v1099_v40 = vsub.f32 %v1075_v32, %v1097_v0  ;;  %v1122_v41 = vadd.f32 %v1120_v34, %v1075_v32 }
 0x481   : > { %v1351_v42 = vmin.f32 %v1350_v35, 255.0  ;;  %v1356_v43 = vmax.f32 %v1102_v36, 0.0  ;;  %v1365_v44 = vmin.f32 %v1364_v37, 255.0  ;;  %v1353_v45 = vmax.f32 %v1081_v38, 0.0 }
 0x482   : > { %v1103_v46 = vsub.f32 %v1099_v40, %v1101_v39  ;;  %v1367_v47 = vmax.f32 %v1122_v41, 0.0 }
 0x483   : > { %v1590_v48 = vcvt.f32.s32 %v1351_v42  ;;  %v1357_v49 = vmin.f32 %v1356_v43, 255.0  ;;  %v1602_v50 = vcvt.f32.s32 %v1365_v44  ;;  %v1354_v51 = vmin.f32 %v1353_v45, 255.0 }
 0x484   : > { %v1359_v52 = vmax.f32 %v1103_v46, 0.0  ;;  %v1368_v53 = vmin.f32 %v1367_v47, 255.0 }
 0x485   : > { %v1090_v54 = vpack.c.b16 %v1590_v48, %v1590_v48  ;;  %v1596_v55 = vcvt.f32.s32 %v1357_v49  ;;  %v1131_v56 = vpack.c.b16 %v1602_v50, %v1602_v50  ;;  %v1593_v57 = vcvt.f32.s32 %v1354_v51 }
 0x486   : > { %v1360_v58 = vmin.f32 %v1359_v52, 255.0  ;;  %v1605_v59 = vcvt.f32.s32 %v1368_v53 }
 0x487   : > { %v1091_v60 = vpack.c.b8 %v1090_v54, %v1090_v54  ;;  %v1112_v61 = vpack.c.b16 %v1596_v55, %v1596_v55  ;;  %v1132_v62 = vpack.c.b8 %v1131_v56, %v1131_v56  ;;  %v1092_v63 = vpack.c.b16 %v1593_v57, %v1593_v57 }
 0x488   : > { %v1599_v2 = vcvt.f32.s32 %v1360_v58  ;;  %v1133_v3 = vpack.c.b16 %v1605_v59, %v1605_v59 }
 0x489   : > { %1094 = vst [vmem:[%s413_s9] sm:$0x3] %v1091_v60  ;;  %v1113_v4 = vpack.c.b8 %v1112_v61, %v1112_v61  ;;  %1370 = vst [vmem:[%s413_s9 + $0x8] sm:$0x3] %v1132_v62  ;;  %v1093_v5 = vpack.c.b8 %v1092_v63, %v1092_v63 }
 0x48a   : > { %v1114_v6 = vpack.c.b16 %v1599_v2, %v1599_v2  ;;  %v1134_v7 = vpack.c.b8 %v1133_v3, %v1133_v3 }
 0x48b   : > { %1362 = vst [vmem:[%s413_s9 + $0x4] sm:$0x3] %v1113_v4  ;;  %1095 = vst [vmem:[%s413_s9 + $0x2] sm:$0x3] %v1093_v5 }
 0x48c   : > { %v1115_v8 = vpack.c.b8 %v1114_v6, %v1114_v6  ;;  %1371 = vst [vmem:[%s413_s9 + $0xa] sm:$0x3] %v1134_v7 }
 0x48e   : > { %1363 = vst [vmem:[%s413_s9 + $0x6] sm:$0x3] %v1115_v8 }
 0x48f   : > { %1970 = shalt.err (!%p1967_p8)
}
 0x490   : > { %s1971_s7 = scalar_lea.hbm %s2495_s20, 192  ;;  %s1975_s21 = scalar_lea.hbm %s2584_s12, 384 }
 0x491   : > { %p1972_p3 = scmp.ne.s32.totalorder %s2495_s20, %s1971_s7  ;;  %p1976_p13 = scmp.lt.u32.totalorder %s2495_s20, %s2584_s12 }
 0x492   : > { %p1977_p1 = scmp.lt.u32.totalorder %s1975_s21, %s1971_s7  ;;  %p1979_p2 = scmp.lt.u32.totalorder %s1971_s7, %s2495_s20 }
 0x493   : > { %p1973_p11 = pnand %p1972_p3, %p2585_p9 }
 0x494   : > { %p1978_p4 = por %p1977_p1, %p1976_p13 }
 0x495   : > { %p1974_p6 = pneg %p1973_p11 }
 0x496   : > { %p1980_p10 = por %p1979_p2, %p1978_p4 }
 0x498   : > { %p1981_p12 = pnand %p1980_p10, %p1974_p6 }
 0x49a   : > { %1984 = shalt.err (!%p1981_p12)
}
 0x49b   : > { %s2070_s23 = smov 32   ;;  %s2071_s15 = smov 2  }
 0x49c   : > { %1633 = dma.vmem_to_hbm [thread:$0]  (%p2585_p9), %s2497_s3, 192, %s2495_s20, %s1139_s27, %s2070_s23, %s2070_s23, %s2071_s15  }
 0x49d PF: > { %s1170_s13 = sand.u32 1, %s2031_s24   ;;  %p2586_p0 = scmp.ne.s32.totalorder %s2580_s19, 0 }
 0x49e   : > { %p2587_p7 = scmp.ge.s32.totalorder %s2051_s29, 2  ;;  %s1171_s17 = scalar_lea.sflag [#allocation4], %s1170_s13 }
 0x4a0   : > { %p1659_p5 = pnand %p2587_p7, %p2586_p0 }
 0x4a2   : > { %2026 = dma.done.wait (!%p1659_p5), %s1171_s17, 192  }
 0x4a3   : > { %2028 = vsyncadd (!%p1659_p5), %s1171_s17, 4294967104  ;;  %s26_s29 = sadd.s32 1, %s2051_s29   ;;  %s2588_s24 = smov %s2035_s25 }
 0x4a4   : > { %p23_p8 = scmp.ge.s32.totalorder %s26_s29, 4   ;;  %s2589_s25 = smov %s2039_s26 }
 0x4a5   : > { %s2590_s26 = smov %s2342_s18  ;;  %s2591_s27 = smov %s2047_s28 }
 0x4a6   : > { %s2592_s28 = smov %s2594_s22  ;;  %25 = sbr.rel (!%p23_p8) target bundleno = 13 (0xd), region = 123 }
 0x4ad   :  { %1176 = vsyncpa [#allocation3], 1 }
 0x4ae   :  { %1178 = vsyncpa [#allocation3 + $0x1], 1 }
 0x4af   :  { %1179 = vsyncpa [#allocation6], 1 }
 0x4b0   :  { %1180 = vsyncpa [#allocation9], 1 }
 0x4b1   :  { %1181 = vsyncpa [#allocation12], 1 }
 0x4b2   :  { %1182 = vsyncpa [#allocation4], 1 }
 0x4b3   :  { %1184 = vsyncpa [#allocation4 + $0x1], 1 }

</bundles_post_ra>
